<compile_context>
chip_gen: v6e
topology: v6e:2x2x1
jax: 0.10.0
libtpu: 0.0.40
codegen_flags: <defaults>
</compile_context>

<pallas_src>
import functools

import jax
import jax.numpy as jnp
from jax import lax
from jax.experimental import pallas as pl
from jax.experimental.pallas import tpu as pltpu

_LANE = 128      # vreg lane width
_SUBLANE = 8     # vreg sublane width


def _round_up(x, m):
    return ((x + m - 1) // m) * m


def _cdiv(a, b):
    return (a + b - 1) // b


# --------------------------------------------------------------------------
# Fused kernel: both towers (block-diagonal) + cosine similarity, one tile of
# the batch per grid step.  Activations are feature-major: x is (2D, TB).
# --------------------------------------------------------------------------
def _two_tower_kernel(x_ref, w1_ref, b1_ref, w2_ref, b2_ref, sim_ref, *, po):
    # ---- layer 1 (both towers): bf16 MXU matmul, f32 accumulate -----------
    x = x_ref[...]                                               # (2D, TB) bf16
    h = jnp.dot(w1_ref[...], x, preferred_element_type=jnp.float32)
    h = jnp.maximum(h + b1_ref[...], 0.0)                        # bias+ReLU, f32

    # ---- layer 2 (both towers) ---------------------------------------------
    proj = jnp.dot(w2_ref[...], h.astype(w2_ref.dtype),
                   preferred_element_type=jnp.float32)
    proj = proj + b2_ref[...]                                    # (2*po, TB) f32

    # Rows [0:po) = doc projection, [po:2*po) = query projection.  Any padded
    # rows (P -> po alignment) are exactly zero and contribute nothing below.
    dp = proj[:po, :]
    qp = proj[po:, :]

    # ---- cosine similarity: sublane reductions (XLU) + rsqrt (EUP) ---------
    dot = jnp.sum(dp * qp, axis=0, keepdims=True)                # (1, TB)
    dn2 = jnp.sum(dp * dp, axis=0, keepdims=True)
    qn2 = jnp.sum(qp * qp, axis=0, keepdims=True)
    eps = jnp.float32(1e-8)
    # rsqrt(max(n2, eps^2)) == 1/max(||.||, eps): per-norm clamp like
    # torch.nn.functional.cosine_similarity.
    inv = lax.rsqrt(jnp.maximum(dn2, eps * eps)) * lax.rsqrt(jnp.maximum(qn2, eps * eps))

    # Lane-dense store: one f32 per score, batch along lanes.
    sim_ref[...] = (dot * inv).astype(sim_ref.dtype)


# --------------------------------------------------------------------------
# One-time parameter packing (hoisted out of the per-call path).
# PyTorch Linear layout is (out_features, in_features); in the feature-major
# orientation y = W @ x + b uses that layout directly — no transposes needed.
# --------------------------------------------------------------------------
def pack_tower_params(doc_params, query_params, dtype=jnp.bfloat16):
    dw1, db1, dw2, db2 = (doc_params[k] for k in ("w1", "b1", "w2", "b2"))
    qw1, qb1, qw2, qb2 = (query_params[k] for k in ("w1", "b1", "w2", "b2"))
    P, D = dw1.shape                      # doc fc1: Linear(D -> P)
    assert qw1.shape == (D, D) and dw2.shape == (P, P) and qw2.shape == (P, D)
    f32 = jnp.float32

    H = P + D                             # hidden rows: [doc hidden | query hidden]
    PO = _round_up(P, _SUBLANE)           # sublane-aligned projection block

    # W1_bd: (H, 2D) = [[doc_fc1, 0], [0, query_fc1]]
    w1 = jnp.zeros((H, 2 * D), f32)
    w1 = w1.at[:P, :D].set(dw1.astype(f32)).at[P:, D:].set(qw1.astype(f32))
    b1 = jnp.concatenate([db1, qb1]).astype(f32).reshape(H, 1)

    # W2_bd: (2*PO, H) = [[doc_fc2, 0], [pad], [0, query_fc2], [pad]]
    w2 = jnp.zeros((2 * PO, H), f32)
    w2 = w2.at[:P, :P].set(dw2.astype(f32)).at[PO:PO + P, P:].set(qw2.astype(f32))
    b2 = jnp.zeros((2 * PO, 1), f32)
    b2 = b2.at[:P, 0].set(db2.astype(f32)).at[PO:PO + P, 0].set(qb2.astype(f32))

    return dict(w1=w1.astype(dtype), b1=b1, w2=w2.astype(dtype), b2=b2,
                d=D, p=P, po=PO)


# --------------------------------------------------------------------------
# Wrappers
# --------------------------------------------------------------------------
def mean_pool_encode(ids, table, mask=None):
    """doc_encode / query_encode: embedding lookup, optional mask, mean over seq."""
    emb = jnp.take(table, ids, axis=0)                # [B, L, D]
    if mask is not None:
        emb = emb * mask[..., None]
    return jnp.mean(emb, axis=1)                      # [B, D]  (divides by full L, like the spec)


def two_tower_score(d_enc, q_enc, packed, *, batch_tile=2048):
    """Fused towers + cosine similarity.  d_enc, q_enc: [B, D].  Returns [B]."""
    B, D = d_enc.shape
    assert packed["d"] == D
    PO = packed["po"]
    H = packed["w1"].shape[0]
    KIN = 2 * D
    f32, bf16 = jnp.float32, jnp.bfloat16

    # ---- generation-aware VMEM budget (v7x: 64 MiB/TC, v5e/v6e: 128 MiB) ---
    try:
        vmem_cap = int(pltpu.get_tpu_info().vmem_capacity_bytes)
    except Exception:
        vmem_cap = 64 * 1024 * 1024                    # conservative v7x floor
    vmem_budget = int(vmem_cap * 0.75)

    weight_bytes = 2 * (packed["w1"].size * 2 + packed["w2"].size * 2
                        + packed["b1"].size * 4 + packed["b2"].size * 4)
    per_col = (KIN * 2 * 2        # activation tile (bf16, double-buffered)
               + 4 * 2            # score row (f32, double-buffered)
               + H * 4 * 2        # hidden + ReLU temp (f32)
               + 2 * PO * 4 * 3)  # projections + cosine temporaries (f32)
    tb_cap = max(_LANE, ((vmem_budget - weight_bytes) // per_col) // _LANE * _LANE)

    # ---- batch tiling --------------------------------------------------------
    if B <= _LANE:
        # Single grid step; the score tile spans the full (tiny) lane extent.
        TB = _round_up(B, _SUBLANE)
    else:
        # Lane-dense multiples of 128, capped by VMEM and by ceil(B/2) so the
        # grid has >= 2 steps and v7x's two TensorCores split the batch.
        TB = max(_LANE, min(_round_up(batch_tile, _LANE),
                            _round_up(_cdiv(B, 2), _LANE),
                            tb_cap))
    B_pad = _round_up(B, TB)
    n_tiles = B_pad // TB

    # ---- feature-major activations: rows = [doc feats ; query feats] --------
    # Natural feature width (no lane padding in HBM); only the batch/lane dim
    # is padded to the tile size.  bf16 halves the activation DMA bytes.
    x_cat = jnp.concatenate([d_enc, q_enc], axis=1).astype(bf16).T   # (2D, B)
    x_cat = jnp.pad(x_cat, ((0, 0), (0, B_pad - B)))

    resident = lambda i: (0, 0)   # weights/biases: same block every step
    by_batch = lambda i: (0, i)   # activations/scores: tiled along lanes

    kernel = functools.partial(_two_tower_kernel, po=PO)
    sim = pl.pallas_call(
        kernel,
        out_shape=jax.ShapeDtypeStruct((1, B_pad), f32),
        grid_spec=pl.GridSpec(
            grid=(n_tiles,),
            in_specs=[
                pl.BlockSpec((KIN, TB), by_batch),              # encodings tile
                pl.BlockSpec(packed["w1"].shape, resident),     # W1 block-diag (bf16)
                pl.BlockSpec(packed["b1"].shape, resident),     # b1 packed (f32)
                pl.BlockSpec(packed["w2"].shape, resident),     # W2 block-diag (bf16)
                pl.BlockSpec(packed["b2"].shape, resident),     # b2 packed (f32)
            ],
            out_specs=pl.BlockSpec((1, TB), by_batch),
        ),
        compiler_params=pltpu.CompilerParams(
            dimension_semantics=("parallel",),      # batch tiles -> both TCs on v7x
            vmem_limit_bytes=vmem_budget,
        ),
    )(x_cat, packed["w1"], packed["b1"], packed["w2"], packed["b2"])

    return sim[0, :B]


def two_tower_forward(doc_ids, query_ids, embedding, packed,
                      doc_mask=None, query_mask=None):
    """Full TwoTowerModel.forward (similarity only)."""
    d_enc = mean_pool_encode(doc_ids, embedding, doc_mask)
    q_enc = mean_pool_encode(query_ids, embedding, query_mask)
    return two_tower_score(d_enc, q_enc, packed)


def _init_linear(key, in_features, out_features, dtype=jnp.float32):
    """PyTorch nn.Linear-style init; returns W in torch (out, in) layout and b."""
    kw, kb = jax.random.split(key)
    bound = 1.0 / (in_features ** 0.5)
    w = jax.random.uniform(kw, (out_features, in_features), dtype,
                           minval=-bound, maxval=bound)
    b = jax.random.uniform(kb, (out_features,), dtype,
                           minval=-bound, maxval=bound)
    return w, b


if __name__ == "__main__":
    batch = 8
    doc_len = 12
    query_len = 6
    vocab = 64
    embedding_dim = 32
    projection_dim = 32

    key = jax.random.PRNGKey(0)
    (k_emb, k_did, k_qid, k_dmask, k_qmask,
     k_d1, k_d2, k_q1, k_q2) = jax.random.split(key, 9)

    embedding = jax.random.normal(k_emb, (vocab, embedding_dim), jnp.float32)
    doc_ids = jax.random.randint(k_did, (batch, doc_len), 0, vocab)
    query_ids = jax.random.randint(k_qid, (batch, query_len), 0, vocab)
    doc_mask = (jax.random.uniform(k_dmask, (batch, doc_len)) > 0.2).astype(jnp.float32)
    query_mask = (jax.random.uniform(k_qmask, (batch, query_len)) > 0.2).astype(jnp.float32)

    # Doc tower: Linear(D, P) -> ReLU -> Linear(P, P)
    dw1, db1 = _init_linear(k_d1, embedding_dim, projection_dim)
    dw2, db2 = _init_linear(k_d2, projection_dim, projection_dim)
    # Query tower: Linear(D, D) -> ReLU -> Linear(D, P)
    qw1, qb1 = _init_linear(k_q1, embedding_dim, embedding_dim)
    qw2, qb2 = _init_linear(k_q2, embedding_dim, projection_dim)

    doc_params = dict(w1=dw1, b1=db1, w2=dw2, b2=db2)
    query_params = dict(w1=qw1, b1=qb1, w2=qw2, b2=qb2)
    packed = pack_tower_params(doc_params, query_params)     # one-time packing

    # ---- case 1: full forward (embedding + masks), tiny batch ---------------
    sim = two_tower_forward(doc_ids, query_ids, embedding, packed,
                            doc_mask=doc_mask, query_mask=query_mask)
    sim = jax.block_until_ready(sim)

    # Pure-JAX f32 reference (same semantics as the PyTorch forward).
    d_enc = mean_pool_encode(doc_ids, embedding, doc_mask)
    q_enc = mean_pool_encode(query_ids, embedding, query_mask)
    d_proj = jnp.maximum(d_enc @ dw1.T + db1, 0.0) @ dw2.T + db2
    q_proj = jnp.maximum(q_enc @ qw1.T + qb1, 0.0) @ qw2.T + qb2
    dn = jnp.maximum(jnp.linalg.norm(d_proj, axis=1), 1e-8)
    qn = jnp.maximum(jnp.linalg.norm(q_proj, axis=1), 1e-8)
    sim_ref = jnp.sum(d_proj * q_proj, axis=1) / (dn * qn)

    assert sim.shape == (batch,)
    # bf16 MXU operands (f32 accumulate) -> looser tolerance than pure f32.
    assert jnp.allclose(sim, sim_ref, atol=3e-2, rtol=0.0), (sim, sim_ref)

    # ---- case 2: larger batch, exercises the multi-tile (>=2 step) path -----
    B2 = 300
    k_de, k_qe = jax.random.split(jax.random.PRNGKey(1))
    d_enc2 = jax.random.normal(k_de, (B2, embedding_dim), jnp.float32)
    q_enc2 = jax.random.normal(k_qe, (B2, embedding_dim), jnp.float32)
    sim2 = jax.block_until_ready(two_tower_score(d_enc2, q_enc2, packed))

    dp2 = jnp.maximum(d_enc2 @ dw1.T + db1, 0.0) @ dw2.T + db2
    qp2 = jnp.maximum(q_enc2 @ qw1.T + qb1, 0.0) @ qw2.T + qb2
    ref2 = jnp.sum(dp2 * qp2, axis=1) / (
        jnp.maximum(jnp.linalg.norm(dp2, axis=1), 1e-8)
        * jnp.maximum(jnp.linalg.norm(qp2, axis=1), 1e-8))
    assert sim2.shape == (B2,)
    assert jnp.allclose(sim2, ref2, atol=3e-2, rtol=0.0), (sim2[:5], ref2[:5])

    print("KERNEL_OK")
</pallas_src>

<mosaic_0001>
module attributes {stable_mosaic.version = 11 : i64} {
  func.func @_two_tower_kernel(%arg0: i32, %arg1: memref<64x8xbf16, #tpu.memory_space<vmem>>, %arg2: memref<64x64xbf16, #tpu.memory_space<vmem>>, %arg3: memref<64x1xf32, #tpu.memory_space<vmem>>, %arg4: memref<64x64xbf16, #tpu.memory_space<vmem>>, %arg5: memref<64x1xf32, #tpu.memory_space<vmem>>, %arg6: memref<1x8xf32, #tpu.memory_space<vmem>>) attributes {dimension_semantics = [#tpu.dimension_semantics<parallel>], iteration_bounds = array<i64: 1>, scalar_prefetch = 0 : i64, scratch_operands = 0 : i64, tpu.core_type = #tpu.core_type<tc>, window_params = [{transform_indices = @transform_0, window_bounds = array<i64: 64, 8>}, {pipeline_mode = #tpu.pipeline_mode<synchronous>, transform_indices = @transform_1, window_bounds = array<i64: 64, 64>}, {pipeline_mode = #tpu.pipeline_mode<synchronous>, transform_indices = @transform_2, window_bounds = array<i64: 64, 1>}, {pipeline_mode = #tpu.pipeline_mode<synchronous>, transform_indices = @transform_3, window_bounds = array<i64: 64, 64>}, {pipeline_mode = #tpu.pipeline_mode<synchronous>, transform_indices = @transform_4, window_bounds = array<i64: 64, 1>}, {transform_indices = @transform_5, window_bounds = array<i64: 1, 8>}]} {
    %c0 = arith.constant 0 : index
    %c0_0 = arith.constant 0 : index
    %0 = vector.load %arg1[%c0, %c0_0] : memref<64x8xbf16, #tpu.memory_space<vmem>>, vector<64x8xbf16>
    %c0_1 = arith.constant 0 : index
    %c0_2 = arith.constant 0 : index
    %1 = vector.load %arg2[%c0_1, %c0_2] : memref<64x64xbf16, #tpu.memory_space<vmem>>, vector<64x64xbf16>
    %cst = arith.constant dense<0.000000e+00> : vector<64x8xf32>
    %2 = tpu.matmul %1, %0, %cst {dimension_numbers = #tpu.dot_dimension_numbers<[1], [0], [0], [1], [0, 0, 1, 1], [], []>} : vector<64x64xbf16>, vector<64x8xbf16>, vector<64x8xf32> -> vector<64x8xf32>
    %c0_3 = arith.constant 0 : index
    %c0_4 = arith.constant 0 : index
    %3 = vector.load %arg3[%c0_3, %c0_4] : memref<64x1xf32, #tpu.memory_space<vmem>>, vector<64x1xf32>
    %4 = vector.broadcast %3 : vector<64x1xf32> to vector<64x8xf32>
    %5 = arith.addf %2, %4 : vector<64x8xf32>
    %cst_5 = arith.constant 0.000000e+00 : f32
    %6 = vector.broadcast %cst_5 : f32 to vector<64x8xf32>
    %7 = arith.maximumf %5, %6 : vector<64x8xf32>
    %c0_6 = arith.constant 0 : index
    %c0_7 = arith.constant 0 : index
    %8 = vector.load %arg4[%c0_6, %c0_7] : memref<64x64xbf16, #tpu.memory_space<vmem>>, vector<64x64xbf16>
    %9 = arith.truncf %7 : vector<64x8xf32> to vector<64x8xbf16>
    %cst_8 = arith.constant dense<0.000000e+00> : vector<64x8xf32>
    %10 = tpu.matmul %8, %9, %cst_8 {dimension_numbers = #tpu.dot_dimension_numbers<[1], [0], [0], [1], [0, 0, 1, 1], [], []>} : vector<64x64xbf16>, vector<64x8xbf16>, vector<64x8xf32> -> vector<64x8xf32>
    %c0_9 = arith.constant 0 : index
    %c0_10 = arith.constant 0 : index
    %11 = vector.load %arg5[%c0_9, %c0_10] : memref<64x1xf32, #tpu.memory_space<vmem>>, vector<64x1xf32>
    %12 = vector.broadcast %11 : vector<64x1xf32> to vector<64x8xf32>
    %13 = arith.addf %10, %12 : vector<64x8xf32>
    %14 = vector.extract_strided_slice %13 {offsets = [0, 0], sizes = [32, 8], strides = [1, 1]} : vector<64x8xf32> to vector<32x8xf32>
    %15 = vector.extract_strided_slice %13 {offsets = [32, 0], sizes = [32, 8], strides = [1, 1]} : vector<64x8xf32> to vector<32x8xf32>
    %16 = arith.mulf %14, %15 : vector<32x8xf32>
    %cst_11 = arith.constant dense<0.000000e+00> : vector<8xf32>
    %17 = vector.multi_reduction <add>, %16, %cst_11 [0] : vector<32x8xf32> to vector<8xf32>
    %18 = vector.shape_cast %17 : vector<8xf32> to vector<1x8xf32>
    %19 = arith.mulf %14, %14 : vector<32x8xf32>
    %cst_12 = arith.constant dense<0.000000e+00> : vector<8xf32>
    %20 = vector.multi_reduction <add>, %19, %cst_12 [0] : vector<32x8xf32> to vector<8xf32>
    %21 = vector.shape_cast %20 : vector<8xf32> to vector<1x8xf32>
    %22 = arith.mulf %15, %15 : vector<32x8xf32>
    %cst_13 = arith.constant dense<0.000000e+00> : vector<8xf32>
    %23 = vector.multi_reduction <add>, %22, %cst_13 [0] : vector<32x8xf32> to vector<8xf32>
    %24 = vector.shape_cast %23 : vector<8xf32> to vector<1x8xf32>
    %cst_14 = arith.constant 9.99999993E-9 : f32
    %cst_15 = arith.constant 9.99999993E-9 : f32
    %25 = arith.mulf %cst_14, %cst_15 : f32
    %26 = vector.broadcast %25 : f32 to vector<1x8xf32>
    %27 = arith.maximumf %21, %26 : vector<1x8xf32>
    %28 = math.rsqrt %27 : vector<1x8xf32>
    %cst_16 = arith.constant 9.99999993E-9 : f32
    %cst_17 = arith.constant 9.99999993E-9 : f32
    %29 = arith.mulf %cst_16, %cst_17 : f32
    %30 = vector.broadcast %29 : f32 to vector<1x8xf32>
    %31 = arith.maximumf %24, %30 : vector<1x8xf32>
    %32 = math.rsqrt %31 : vector<1x8xf32>
    %33 = arith.mulf %28, %32 : vector<1x8xf32>
    %34 = arith.mulf %18, %33 : vector<1x8xf32>
    %c0_18 = arith.constant 0 : index
    %c0_19 = arith.constant 0 : index
    %35 = vector.load %arg6[%c0_18, %c0_19] : memref<1x8xf32, #tpu.memory_space<vmem>>, vector<1x8xf32>
    tpu.vector_store %arg6[%c0_18, %c0_19], %34 {strides = array<i32>} : memref<1x8xf32, #tpu.memory_space<vmem>>, vector<1x8xf32>,
    return
  }
  func.func @transform_0(%arg0: i32) -> (i32, i32) {
    %c0_i32 = arith.constant 0 : i32
    %c0_i32_0 = arith.constant 0 : i32
    return %c0_i32, %arg0 : i32, i32
  }
  func.func @transform_1(%arg0: i32) -> (i32, i32) {
    %c0_i32 = arith.constant 0 : i32
    %c0_i32_0 = arith.constant 0 : i32
    %c0_i32_1 = arith.constant 0 : i32
    return %c0_i32, %c0_i32_0 : i32, i32
  }
  func.func @transform_2(%arg0: i32) -> (i32, i32) {
    %c0_i32 = arith.constant 0 : i32
    %c0_i32_0 = arith.constant 0 : i32
    %c0_i32_1 = arith.constant 0 : i32
    return %c0_i32, %c0_i32_0 : i32, i32
  }
  func.func @transform_3(%arg0: i32) -> (i32, i32) {
    %c0_i32 = arith.constant 0 : i32
    %c0_i32_0 = arith.constant 0 : i32
    %c0_i32_1 = arith.constant 0 : i32
    return %c0_i32, %c0_i32_0 : i32, i32
  }
  func.func @transform_4(%arg0: i32) -> (i32, i32) {
    %c0_i32 = arith.constant 0 : i32
    %c0_i32_0 = arith.constant 0 : i32
    %c0_i32_1 = arith.constant 0 : i32
    return %c0_i32, %c0_i32_0 : i32, i32
  }
  func.func @transform_5(%arg0: i32) -> (i32, i32) {
    %c0_i32 = arith.constant 0 : i32
    %c0_i32_0 = arith.constant 0 : i32
    return %c0_i32, %arg0 : i32, i32
  }
}

</mosaic_0001>

<bundles_post_ra>
// kernel: tpu_custom_call.1
= control target key start
LH: loop header
LB: loop body
LE: loop exit
PB: predicated region body
PF: predicated region fallthrough
CT: control target
= control target key end

     0   :  { %v557_v2 = vmov 0   ;;  %vm130_vm0 = vcmask 523264   ;;  %s696_s0 = inlined_call_operand.vmem [shape: bf16[64,8], index: 0, kind: input, shape index: {}]   ;;  %s697_s1 = inlined_call_operand.vmem [shape: bf16[64,64], index: 1, kind: input, shape index: {}]   ;;  %s698_s2 = inlined_call_operand.vmem [shape: f32[64,1], index: 2, kind: input, shape index: {}]   ;;  %s699_s3 = inlined_call_operand.vmem [shape: bf16[64,64], index: 3, kind: input, shape index: {}]   ;;  %s700_s4 = inlined_call_operand.vmem [shape: f32[64,1], index: 4, kind: input, shape index: {}]   ;;  %s701_s5 = inlined_call_operand.hbm [shape: f32[1,8], index: 5, kind: output, shape index: {}]  }
   0x1   :  { %v519_v0 = vld [vmem:[%s696_s0 + $0x18] sm:$0xff]   ;;  %v520_v1 = vld [vmem:[%s696_s0 + $0x10] sm:$0xff]   ;;  %517 = vset.pattern.permute.xlu0 %v557_v2  ;;  %v521_v3 = vld [vmem:[%s696_s0 + $0x8] sm:$0xff]   ;;  %518 = vset.pattern.permute.xlu1 %v557_v2 }
   0x2   :  { %483 = vmatprep.subr.bf16.mxu0 %v519_v0  ;;  %v523_v4 = vld [vmem:[%s697_s1] sm:$0xff]   ;;  %v44_v6 = vld [vmem:[%s698_s2 + $0x30] sm:$0xff]  ;;  %v45_v8 = vld [vmem:[%s698_s2 + $0x38] sm:$0xff] }
   0x3   :  { %484 = vmatpush3.bf16.msra.mxu0 %v519_v0  ;;  %491 = vmatprep.mubr.msk.bf16.mxu0 %vm130_vm0, %v523_v4  ;;  %v522_v5 = vld [vmem:[%s696_s0] sm:$0xff]   ;;  %v43_v9 = vld [vmem:[%s698_s2 + $0x28] sm:$0xff]  ;;  %v40_v11 = vld [vmem:[%s698_s2 + $0x10] sm:$0xff] }
   0x4   :  { %485 = vmatprep.subr.bf16.mxu0 %v520_v1  ;;  %v42_v7 = vld [vmem:[%s698_s2 + $0x20] sm:$0xff]  ;;  %78 = vperm.xlu0 %517, %v44_v6   ;;  %v524_v10 = vld [vmem:[%s697_s1 + $0x8] sm:$0xff]   ;;  %v525_v12 = vld [vmem:[%s697_s1 + $0x10] sm:$0xff]  }
   0x5   :  { %68 = vperm.xlu1 %518, %v42_v7   ;;  %v41_v13 = vld [vmem:[%s698_s2 + $0x18] sm:$0xff] }
   0x7   :  { %486 = vmatpush3.bf16.msra.mxu0 %v520_v1 }
   0x8   :  { %487 = vmatprep.subr.bf16.mxu0 %v521_v3  ;;  %83 = vperm.xlu0 %517, %v45_v8  }
   0x9   :  { %73 = vperm.xlu1 %518, %v43_v9  }
   0xb   :  { %488 = vmatpush3.bf16.msra.mxu0 %v521_v3 }
   0xc   :  { %489 = vmatprep.subr.bf16.mxu0 %v522_v5 }
   0xf   :  { %490 = vmatpush3.bf16.msra.mxu0 %v522_v5 }
  0x10   :  { %10 = vsyncpa [#allocation3], 0  ;;  %58 = vperm.xlu0 %517, %v40_v11   ;;  %63 = vperm.xlu1 %518, %v41_v13   ;;  %v38_v14 = vld [vmem:[%s698_s2] sm:$0xff]  ;;  %v39_v15 = vld [vmem:[%s698_s2 + $0x8] sm:$0xff]  ;;  %vm377_vm1 = vcmask 64512   ;;  %vm431_vm2 = vcmask 57344  }
  0x11   :  { %v526_v16 = vld [vmem:[%s697_s1 + $0x18] sm:$0xff]   ;;  %v228_v17 = vld [vmem:[%s700_s4] sm:$0xff]  ;;  %v229_v18 = vld [vmem:[%s700_s4 + $0x8] sm:$0xff] }
  0x12   :  { %492 = vmatmul.mubr.msk.bf16.vlgmr.msra.gmra.mxu0 %vm130_vm0, %v524_v10  ;;  %v232_v19 = vld [vmem:[%s700_s4 + $0x20] sm:$0xff]  ;;  %v233_v20 = vld [vmem:[%s700_s4 + $0x28] sm:$0xff]  ;;  %v230_v21 = vld [vmem:[%s700_s4 + $0x10] sm:$0xff] }
  0x13   :  { %495 = vmatprep.mubr.msk.bf16.mxu0 %vm130_vm0, %v525_v12  ;;  %v234_v22 = vld [vmem:[%s700_s4 + $0x30] sm:$0xff]  ;;  %v231_v23 = vld [vmem:[%s700_s4 + $0x18] sm:$0xff]  ;;  %v527_v25 = vld [vmem:[%s699_s3] sm:$0xff]  }
  0x14   :  { %48 = vperm.xlu0 %517, %v38_v14   ;;  %53 = vperm.xlu1 %518, %v39_v15   ;;  %v235_v24 = vld [vmem:[%s700_s4 + $0x38] sm:$0xff]  ;;  %v528_v62 = vld [vmem:[%s699_s3 + $0x8] sm:$0xff]   ;;  %v529_v63 = vld [vmem:[%s699_s3 + $0x10] sm:$0xff]  }
  0x15   :  { %507 = vmatprep.mubr.msk.bf16.mxu1 %vm130_vm0, %v527_v25  ;;  %v530_v0 = vld [vmem:[%s699_s3 + $0x18] sm:$0xff]   ;;  %s558_s3 = smov [#allocation2]  }
  0x16   :  { %s439_s19 = sshll.u32 %s558_s3, 4  ;;  %s440_s19 = int_to_ptr.vmem [resolvable:$true] %s439_s19 }
  0x17   :  { %s535_s20 = scalar_lea.vmem %s440_s19, 16  ;;  %s539_s21 = scalar_lea.vmem %s440_s19, 32 }
  0x18   :  { %238 = vperm.xlu0 %517, %v228_v17   ;;  %243 = vperm.xlu1 %518, %v229_v18   ;;  %p536_p0 = scmp.ne.s32.totalorder %s440_s19, %s535_s20  ;;  %p540_p1 = scmp.lt.s32.totalorder %s440_s19, %s440_s19 }
  0x19   :  { %p541_p2 = scmp.lt.s32.totalorder %s539_s21, %s535_s20 }
  0x1a   :  { %496 = vmatmul.mubr.msk.bf16.gmra.mxu0 %vm130_vm0, %v526_v16 }
  0x1b   :  { %p542_p3 = por %p541_p2, %p540_p1 }
  0x1c   :  { %258 = vperm.xlu0 %517, %v232_v19   ;;  %263 = vperm.xlu1 %518, %v233_v20  }
  0x1d   :  { %p543_p4 = pnand %p542_p3, %p536_p0 }
  0x20   :  { %248 = vperm.xlu0 %517, %v230_v21   ;;  %268 = vperm.xlu1 %518, %v234_v22  }
  0x24   :  { %253 = vperm.xlu0 %517, %v231_v23   ;;  %273 = vperm.xlu1 %518, %v235_v24  }
  0x7f   :  { %v79_v28 = vpop.permute.xlu0 %78 }
  0x80   :  { %v69_v26 = vpop.permute.xlu1 %68 }
  0x83   :  { %v84_v33 = vpop.permute.xlu0 %83 }
  0x84   :  { %v74_v31 = vpop.permute.xlu1 %73 }
  0x8b   :  { %v64_v37 = vpop.permute.xlu1 %63  ;;  %v59_v41 = vpop.permute.xlu0 %58 }
  0x8f   :  { %v54_v51 = vpop.permute.xlu1 %53  ;;  %v49_v55 = vpop.permute.xlu0 %48 }
  0x93   :  { %v239_v1 = vpop.permute.xlu0 %238  ;;  %v244_v3 = vpop.permute.xlu1 %243 }
  0x97   :  { %v259_v2 = vpop.permute.xlu0 %258  ;;  %v264_v6 = vpop.permute.xlu1 %263 }
  0x9b   :  { %v249_v4 = vpop.permute.xlu0 %248  ;;  %v269_v16 = vpop.permute.xlu1 %268 }
  0x9f   :  { %v254_v11 = vpop.permute.xlu0 %253 }
  0xd2   :  { %v493_v27 = vpop.f32.mrf.mxu0 }
  0xd3   :  { %v186_v47 = vadd.f32 %v493_v27, %v59_v41 }
  0xd4   :  { %v177_v29 = vpop.f32.mrf.mxu0 }
  0xd5   :  { %v210_v56 = vmax.f32 %v186_v47, 0.0  ;;  %v178_v57 = vadd.f32 %v177_v29, %v49_v55  ;;  %v274_v29 = vpop.permute.xlu1 %273 }
  0xd6   :  { %v494_v30 = vpop.f32.mrf.mxu0 }
  0xd7   :  { %v189_v43 = vadd.f32 %v494_v30, %v64_v37  ;;  %v208_v60 = vmax.f32 %v178_v57, 0.0 }
  0xd8   :  { %v180_v32 = vpop.f32.mrf.mxu0 }
  0xd9   :  { %v211_v52 = vmax.f32 %v189_v43, 0.0  ;;  %v181_v53 = vadd.f32 %v180_v32, %v54_v51 }
  0xda   :  { %v497_v34 = vpop.f32.mrf.mxu0 }
  0xdb   :  { %v202_v36 = vadd.f32 %v497_v34, %v79_v28  ;;  %v225_v58 = vpack.c.bf16 %v211_v52, %v210_v56  ;;  %v209_v59 = vmax.f32 %v181_v53, 0.0 }
  0xdc   :  { %v193_v35 = vpop.f32.mrf.mxu0 }
  0xdd   :  { %v194_v39 = vadd.f32 %v193_v35, %v69_v26  ;;  %v214_v44 = vmax.f32 %v202_v36, 0.0  ;;  %v224_v61 = vpack.c.bf16 %v209_v59, %v208_v60 }
  0xde   :  { %v498_v38 = vpop.f32.mrf.mxu0 }
  0xdf   :  { %v205_v40 = vadd.f32 %v498_v38, %v84_v33  ;;  %v212_v48 = vmax.f32 %v194_v39, 0.0 }
  0xe0   :  { %v196_v42 = vpop.f32.mrf.mxu0 }
  0xe1   :  { %v215_v45 = vmax.f32 %v205_v40, 0.0  ;;  %v197_v46 = vadd.f32 %v196_v42, %v74_v31 }
  0xe3   :  { %v213_v49 = vmax.f32 %v197_v46, 0.0  ;;  %v227_v50 = vpack.c.bf16 %v215_v45, %v214_v44 }
  0xe5   :  { %v226_v54 = vpack.c.bf16 %v213_v49, %v212_v48  ;;  %499 = vmatprep.subr.bf16.mxu1 %v227_v50 }
  0xe6   :  { %500 = vmatpush3.bf16.msra.mxu1 %v227_v50 }
  0xe7   :  { %501 = vmatprep.subr.bf16.mxu1 %v226_v54 }
  0xea   :  { %502 = vmatpush3.bf16.msra.mxu1 %v226_v54 }
  0xeb   :  { %503 = vmatprep.subr.bf16.mxu1 %v225_v58 }
  0xee   :  { %504 = vmatpush3.bf16.msra.mxu1 %v225_v58 }
  0xef   :  { %505 = vmatprep.subr.bf16.mxu1 %v224_v61 }
  0xf2   :  { %506 = vmatpush3.bf16.msra.mxu1 %v224_v61 }
  0xf5   :  { %508 = vmatmul.mubr.msk.bf16.vlgmr.msra.gmra.mxu1 %vm130_vm0, %v528_v62 }
  0xf6   :  { %511 = vmatprep.mubr.msk.bf16.mxu1 %vm130_vm0, %v529_v63 }
  0xfd   :  { %512 = vmatmul.mubr.msk.bf16.gmra.mxu1 %vm130_vm0, %v530_v0 }
 0x1b5   :  { %v509_v5 = vpop.f32.mrf.mxu1 }
 0x1b6   :  { %v351_v10 = vadd.f32 %v509_v5, %v249_v4 }
 0x1b7   :  { %v342_v7 = vpop.f32.mrf.mxu1 }
 0x1b8   :  { %v343_v8 = vadd.f32 %v342_v7, %v239_v1  ;;  %v393_v18 = vmul.f32 %v351_v10, %v351_v10 }
 0x1b9   :  { %v510_v9 = vpop.f32.mrf.mxu1 }
 0x1ba   :  { %v391_v13 = vmul.f32 %v343_v8, %v343_v8  ;;  %v354_v14 = vadd.f32 %v510_v9, %v254_v11  ;;  %v398_v27 = vsel %vm377_vm1, %v393_v18, 0.0 }
 0x1bb   :  { %v345_v12 = vpop.f32.mrf.mxu1 }
 0x1bc   :  { %v346_v15 = vadd.f32 %v345_v12, %v244_v3  ;;  %v395_v21 = vsel %vm377_vm1, %v391_v13, 0.0  ;;  %v394_v22 = vmul.f32 %v354_v14, %v354_v14 }
 0x1bd   :  { %v513_v17 = vpop.f32.mrf.mxu1 }
 0x1be   :  { %v392_v19 = vmul.f32 %v346_v15, %v346_v15  ;;  %v367_v28 = vadd.f32 %v513_v17, %v269_v16  ;;  %v400_v32 = vsel %vm377_vm1, %v394_v22, 0.0 }
 0x1bf   :  { %v358_v20 = vpop.f32.mrf.mxu1 }
 0x1c0   :  { %v396_v23 = vsel %vm377_vm1, %v392_v19, 0.0  ;;  %v359_v24 = vadd.f32 %v358_v20, %v259_v2  ;;  %v410_v37 = vmul.f32 %v367_v28, %v367_v28  ;;  %v375_v48 = vmul.f32 %v367_v28, %v351_v10 }
 0x1c1   :  { %v397_v25 = vadd.f32 %v396_v23, %v395_v21  ;;  %v514_v26 = vpop.f32.mrf.mxu1 }
 0x1c2   :  { %v408_v33 = vmul.f32 %v359_v24, %v359_v24  ;;  %v370_v34 = vadd.f32 %v514_v26, %v274_v29  ;;  %v373_v38 = vmul.f32 %v359_v24, %v343_v8  ;;  %v415_v49 = vsel %vm377_vm1, %v410_v37, 0.0 }
 0x1c3   :  { %v399_v30 = vadd.f32 %v398_v27, %v397_v25  ;;  %v361_v31 = vpop.f32.mrf.mxu1  ;;  %v381_v57 = vsel %vm377_vm1, %v375_v48, 0.0 }
 0x1c4   :  { %v362_v35 = vadd.f32 %v361_v31, %v264_v6  ;;  %v412_v42 = vsel %vm377_vm1, %v408_v33, 0.0  ;;  %v411_v43 = vmul.f32 %v370_v34, %v370_v34  ;;  %v378_v50 = vsel %vm377_vm1, %v373_v38, 0.0 }
 0x1c5   :  { %v401_v36 = vadd.f32 %v400_v32, %v399_v30  ;;  %v376_v58 = vmul.f32 %v370_v34, %v354_v14 }
 0x1c6   :  { %v374_v39 = vmul.f32 %v362_v35, %v346_v15  ;;  %v409_v40 = vmul.f32 %v362_v35, %v362_v35  ;;  %v417_v54 = vsel %vm377_vm1, %v411_v43, 0.0 }
 0x1c7   :  { %v402_v41 = vrot.slane %v401_v36, 4  ;;  %v383_v63 = vsel %vm377_vm1, %v376_v58, 0.0 }
 0x1c8   :  { %v379_v44 = vsel %vm377_vm1, %v374_v39, 0.0  ;;  %v413_v45 = vsel %vm377_vm1, %v409_v40, 0.0 }
 0x1c9   :  { %v403_v46 = vadd.f32 %v402_v41, %v401_v36  ;;  %v414_v47 = vadd.f32 %v413_v45, %v412_v42  ;;  %v380_v52 = vadd.f32 %v379_v44, %v378_v50 }
 0x1cb   :  { %v404_v51 = vrot.slane %v403_v46, 2  ;;  %v416_v53 = vadd.f32 %v415_v49, %v414_v47  ;;  %v382_v59 = vadd.f32 %v381_v57, %v380_v52 }
 0x1cd   :  { %v405_v55 = vadd.f32 %v404_v51, %v403_v46  ;;  %v418_v56 = vadd.f32 %v417_v54, %v416_v53  ;;  %v384_v0 = vadd.f32 %v383_v63, %v382_v59 }
 0x1cf   :  { %v419_v60 = vrot.slane %v418_v56, 4  ;;  %v406_v61 = vrot.slane %v405_v55, 1  ;;  %v385_v4 = vrot.slane %v384_v0, 4 }
 0x1d1   :  { %v420_v62 = vadd.f32 %v419_v60, %v418_v56  ;;  %v407_v2 = vadd.f32 %v406_v61, %v405_v55  ;;  %v386_v9 = vadd.f32 %v385_v4, %v384_v0 }
 0x1d3   :  { %v421_v1 = vrot.slane %v420_v62, 2  ;;  %v425_v6 = vmax.f32 %v407_v2, 1e-16  ;;  %v387_v10 = vrot.slane %v386_v9, 2 }
 0x1d5   :  { %v422_v3 = vadd.f32 %v421_v1, %v420_v62  ;;  %531 = vrsqrt.f32 %v425_v6  ;;  %v388_v11 = vadd.f32 %v387_v10, %v386_v9 }
 0x1d7   :  { %v423_v5 = vrot.slane %v422_v3, 1  ;;  %v389_v12 = vrot.slane %v388_v11, 1 }
 0x1d9   :  { %v424_v7 = vadd.f32 %v423_v5, %v422_v3  ;;  %v390_v15 = vadd.f32 %v389_v12, %v388_v11 }
 0x1db   :  { %v427_v8 = vmax.f32 %v424_v7, 1e-16 }
 0x1dd   :  { %533 = vrsqrt.f32 %v427_v8 }
 0x1e2   :  { %v532_v13 = vpop.eup %531 }
 0x1ea   :  { %v534_v14 = vpop.eup %533 }
 0x1eb   :  { %v429_v16 = vmul.f32 %v534_v14, %v532_v13 }
 0x1ed   :  { %v430_v17 = vmul.f32 %v429_v16, %v390_v15 }
 0x1ef   :  { %432 = vst.msk [vmem:[#allocation2] sm:$0x1] %vm431_vm2, %v430_v17 }
 0x1f0   :  { %546 = shalt.err (!%p543_p4)
}
 0x1f1   :  { %442 = dma.vmem_to_hbm [thread:$0]  %s440_s19, 16, %s701_s5, [#allocation3]  }
 0x1f2   :  { %555 = dma.done.wait [#allocation3], 16  }
 0x1f3   :  { %556 = vsyncadd [#allocation3], 4294967280 }
 0x1f4   :  { %446 = vsyncpa [#allocation3], 1 }

</bundles_post_ra>
